<compile_context>
chip_gen: v5e
topology: v5e:2x2
jax: 0.10.0
libtpu: 0.0.40
codegen_flags: <defaults>
</compile_context>

<pallas_src>
import jax
import jax.numpy as jnp
from jax.experimental import pallas as pl
from jax.experimental.pallas import tpu as pltpu

_LANE = 128


def _feature_select_kernel(alpha_ref, x_ref, sel_ref, prob_ref):
    # alpha_ref: (1, Dp)   x_ref / sel_ref / prob_ref: (TILE_B, Dp)
    # Sigmoid in f32 on the tiny alpha row (EUP), then cast once to x dtype so
    # the returned probabilities and the multiply operand are identical.
    probs = jax.nn.sigmoid(alpha_ref[...].astype(jnp.float32)).astype(sel_ref.dtype)
    prob_ref[...] = jnp.broadcast_to(probs, prob_ref.shape)
    sel_ref[...] = probs * x_ref[...]          # native-dtype multiply (bf16 stays bf16)


def _vmem_capacity_bytes():
    """Generation-aware VMEM size; conservative (v7x-sized) fallback."""
    try:
        info = pltpu.get_tpu_info()
        cap = getattr(info, "vmem_capacity_bytes", None)
        if cap:
            return int(cap)
    except Exception:
        pass
    return 64 << 20


def _vmem_budget_bytes():
    # Total working-set budget for the pipelined tiles (well under physical).
    return min(_vmem_capacity_bytes() // 3, 24 << 20)


def _pick_tile_b(b_rows, d_lanes, dtype):
    """Largest row tile hitting ~2-4 MiB per buffer (x, sel, prob x2 buffers)."""
    itemsize = jnp.dtype(dtype).itemsize
    sublane = {1: 32, 2: 16, 4: 8}.get(itemsize, 8)
    per_buffer = _vmem_budget_bytes() // 6     # 3 tiles, double-buffered
    tile = max(sublane, per_buffer // max(1, d_lanes * itemsize))
    if tile >= b_rows:
        return b_rows                          # full dim: always a legal block
    return max(sublane, (tile // sublane) * sublane)


def _vmem_limit_bytes(tile_b, d_lanes, itemsize):
    working = 6 * tile_b * d_lanes * itemsize + 2 * d_lanes * 4   # tiles + alpha
    limit = working + (4 << 20)                                   # headroom
    cap = _vmem_capacity_bytes()
    return int(min(max(limit, 16 << 20), max(cap - (8 << 20), 16 << 20)))


def enhanced_feature_selector_forward(x, alpha, *, tile_b=None, force_pallas=False):
    """x: (B, D), alpha: (D,) -> (selected (B, D), probabilities (B, D))."""
    B, D = x.shape
    itemsize = jnp.dtype(x.dtype).itemsize

    # Small-problem fast path: launch overhead dominates below ~1 MiB.
    if not force_pallas and B * D * itemsize < (1 << 20):
        probs = jax.nn.sigmoid(alpha.astype(jnp.float32)).astype(x.dtype)
        prob = jnp.broadcast_to(probs[None, :], (B, D))
        return prob * x, prob

    # Lane-dense repack: group g consecutive rows into one 128-lane-multiple row.
    group = 1
    if D < _LANE and _LANE % D == 0:
        g = _LANE // D
        if B % g == 0:
            group = g
    Bp, Dp = B // group, D * group
    x_p = x.reshape(Bp, Dp)                         # contiguous reshape (free)
    alpha_p = jnp.tile(alpha, group).reshape(1, Dp)  # tiled along lanes

    if tile_b is None:
        tile_b = _pick_tile_b(Bp, Dp, x.dtype)
    tile_b = max(1, min(tile_b, Bp))
    grid = (pl.cdiv(Bp, tile_b),)

    sel_p, prob_p = pl.pallas_call(
        _feature_select_kernel,
        out_shape=(
            jax.ShapeDtypeStruct((Bp, Dp), x.dtype),
            jax.ShapeDtypeStruct((Bp, Dp), x.dtype),
        ),
        grid=grid,
        in_specs=[
            pl.BlockSpec((1, Dp), lambda i: (0, 0)),        # alpha: pinned, reused
            pl.BlockSpec((tile_b, Dp), lambda i: (i, 0)),   # x: row tile
        ],
        out_specs=[
            pl.BlockSpec((tile_b, Dp), lambda i: (i, 0)),   # selected
            pl.BlockSpec((tile_b, Dp), lambda i: (i, 0)),   # probabilities
        ],
        compiler_params=pltpu.CompilerParams(
            dimension_semantics=("parallel",),              # megacore row sharding
            vmem_limit_bytes=_vmem_limit_bytes(tile_b, Dp, itemsize),
        ),
    )(alpha_p, x_p)

    return sel_p.reshape(B, D), prob_p.reshape(B, D)


def _ref(x, alpha):
    p = jax.nn.sigmoid(alpha.astype(jnp.float32)).astype(x.dtype)
    p = jnp.broadcast_to(p[None, :], x.shape)
    return p * x, p


if __name__ == "__main__":
    key = jax.random.PRNGKey(0)
    k_alpha, k_x = jax.random.split(key)

    # Module-default-scale shapes: batch=2, input_dim=32.
    B, D = 2, 32
    alpha = jax.random.uniform(k_alpha, (D,), dtype=jnp.float32)   # torch.rand-style init
    x = jax.random.normal(k_x, (B, D), dtype=jnp.float32)
    rsel, rprob = _ref(x, alpha)

    # 1) Default path (small-shape fast path).
    sel, prob = enhanced_feature_selector_forward(x, alpha)
    jax.block_until_ready((sel, prob))
    assert jnp.allclose(sel, rsel, atol=1e-6, rtol=1e-6)
    assert jnp.allclose(prob, rprob, atol=1e-6, rtol=1e-6)

    # 2) Same shape through the Pallas kernel (non-repacked, single tile).
    sel, prob = enhanced_feature_selector_forward(x, alpha, force_pallas=True)
    jax.block_until_ready((sel, prob))
    assert jnp.allclose(sel, rsel, atol=1e-6, rtol=1e-6)
    assert jnp.allclose(prob, rprob, atol=1e-6, rtol=1e-6)

    # 3) Lane-dense repacked path, multi-tile grid: B=64 -> packed (16,128), tile 8 -> grid (2,).
    x3 = jax.random.normal(jax.random.PRNGKey(1), (64, D), dtype=jnp.float32)
    sel3, prob3 = enhanced_feature_selector_forward(x3, alpha, tile_b=8, force_pallas=True)
    jax.block_until_ready((sel3, prob3))
    r3s, r3p = _ref(x3, alpha)
    assert jnp.allclose(sel3, r3s, atol=1e-6, rtol=1e-6)
    assert jnp.allclose(prob3, r3p, atol=1e-6, rtol=1e-6)

    # 4) Repacked + partial last tile: B=36 -> packed (9,128), tile 8 -> grid (2,), tail masked.
    x4 = jax.random.normal(jax.random.PRNGKey(2), (36, D), dtype=jnp.float32)
    sel4, prob4 = enhanced_feature_selector_forward(x4, alpha, tile_b=8, force_pallas=True)
    jax.block_until_ready((sel4, prob4))
    r4s, r4p = _ref(x4, alpha)
    assert jnp.allclose(sel4, r4s, atol=1e-6, rtol=1e-6)
    assert jnp.allclose(prob4, r4p, atol=1e-6, rtol=1e-6)

    # 5) Non-repackable D (160) + non-divisible B (10 rows, tile 8 -> partial tile).
    D5 = 160
    alpha5 = jax.random.uniform(jax.random.PRNGKey(3), (D5,), dtype=jnp.float32)
    x5 = jax.random.normal(jax.random.PRNGKey(4), (10, D5), dtype=jnp.float32)
    sel5, prob5 = enhanced_feature_selector_forward(x5, alpha5, tile_b=8, force_pallas=True)
    jax.block_until_ready((sel5, prob5))
    r5s, r5p = _ref(x5, alpha5)
    assert jnp.allclose(sel5, r5s, atol=1e-6, rtol=1e-6)
    assert jnp.allclose(prob5, r5p, atol=1e-6, rtol=1e-6)

    # 6) bf16 inputs (native bf16 multiply in-kernel; prob*x is bit-exact vs returned prob).
    x6 = jax.random.normal(jax.random.PRNGKey(5), (64, D), dtype=jnp.bfloat16)
    sel6, prob6 = enhanced_feature_selector_forward(x6, alpha, tile_b=16, force_pallas=True)
    jax.block_until_ready((sel6, prob6))
    r6s, r6p = _ref(x6, alpha)
    assert jnp.allclose(sel6.astype(jnp.float32), r6s.astype(jnp.float32), atol=1e-2, rtol=1e-2)
    assert jnp.allclose(prob6.astype(jnp.float32), r6p.astype(jnp.float32), atol=1e-2, rtol=1e-2)

    print("KERNEL_OK")
</pallas_src>

<mosaic_0001>
module attributes {stable_mosaic.version = 11 : i64} {
  func.func @_feature_select_kernel(%arg0: i32, %arg1: memref<1x32xf32, #tpu.memory_space<vmem>>, %arg2: memref<2x32xf32, #tpu.memory_space<vmem>>, %arg3: memref<2x32xf32, #tpu.memory_space<vmem>>, %arg4: memref<2x32xf32, #tpu.memory_space<vmem>>) attributes {dimension_semantics = [#tpu.dimension_semantics<parallel>], iteration_bounds = array<i64: 1>, scalar_prefetch = 0 : i64, scratch_operands = 0 : i64, tpu.core_type = #tpu.core_type<tc>, window_params = [{pipeline_mode = #tpu.pipeline_mode<synchronous>, transform_indices = @transform_0, window_bounds = array<i64: 1, 32>}, {transform_indices = @transform_1, window_bounds = array<i64: 2, 32>}, {transform_indices = @transform_2, window_bounds = array<i64: 2, 32>}, {transform_indices = @transform_3, window_bounds = array<i64: 2, 32>}]} {
    %c0 = arith.constant 0 : index
    %c0_0 = arith.constant 0 : index
    %0 = vector.load %arg1[%c0, %c0_0] : memref<1x32xf32, #tpu.memory_space<vmem>>, vector<1x32xf32>
    %1 = arith.negf %0 : vector<1x32xf32>
    %2 = math.exp %1 : vector<1x32xf32>
    %cst = arith.constant 1.000000e+00 : f32
    %3 = vector.broadcast %cst : f32 to vector<1x32xf32>
    %4 = arith.addf %3, %2 : vector<1x32xf32>
    %5 = arith.divf %3, %4 : vector<1x32xf32>
    %6 = vector.shape_cast %5 : vector<1x32xf32> to vector<1x32xf32>
    %7 = vector.broadcast %6 : vector<1x32xf32> to vector<2x32xf32>
    %c0_1 = arith.constant 0 : index
    %c0_2 = arith.constant 0 : index
    %8 = vector.load %arg4[%c0_1, %c0_2] : memref<2x32xf32, #tpu.memory_space<vmem>>, vector<2x32xf32>
    tpu.vector_store %arg4[%c0_1, %c0_2], %7 {strides = array<i32>} : memref<2x32xf32, #tpu.memory_space<vmem>>, vector<2x32xf32>,
    %c0_3 = arith.constant 0 : index
    %c0_4 = arith.constant 0 : index
    %9 = vector.load %arg2[%c0_3, %c0_4] : memref<2x32xf32, #tpu.memory_space<vmem>>, vector<2x32xf32>
    %10 = vector.broadcast %5 : vector<1x32xf32> to vector<2x32xf32>
    %11 = arith.mulf %10, %9 : vector<2x32xf32>
    %c0_5 = arith.constant 0 : index
    %c0_6 = arith.constant 0 : index
    %12 = vector.load %arg3[%c0_5, %c0_6] : memref<2x32xf32, #tpu.memory_space<vmem>>, vector<2x32xf32>
    tpu.vector_store %arg3[%c0_5, %c0_6], %11 {strides = array<i32>} : memref<2x32xf32, #tpu.memory_space<vmem>>, vector<2x32xf32>,
    return
  }
  func.func @transform_0(%arg0: i32) -> (i32, i32) {
    %c0_i32 = arith.constant 0 : i32
    %c0_i32_0 = arith.constant 0 : i32
    %c0_i32_1 = arith.constant 0 : i32
    return %c0_i32, %c0_i32_0 : i32, i32
  }
  func.func @transform_1(%arg0: i32) -> (i32, i32) {
    %c0_i32 = arith.constant 0 : i32
    %c0_i32_0 = arith.constant 0 : i32
    return %arg0, %c0_i32 : i32, i32
  }
  func.func @transform_2(%arg0: i32) -> (i32, i32) {
    %c0_i32 = arith.constant 0 : i32
    %c0_i32_0 = arith.constant 0 : i32
    return %arg0, %c0_i32 : i32, i32
  }
  func.func @transform_3(%arg0: i32) -> (i32, i32) {
    %c0_i32 = arith.constant 0 : i32
    %c0_i32_0 = arith.constant 0 : i32
    return %arg0, %c0_i32 : i32, i32
  }
}

</mosaic_0001>

<bundles_post_ra>
// kernel: tpu_custom_call.1
= control target key start
LH: loop header
LB: loop body
LE: loop exit
PB: predicated region body
PF: predicated region fallthrough
CT: control target
= control target key end

     0   :  { %9 = vsyncpa [#allocation3], 0  ;;  %s254_s0 = inlined_call_operand.hbm [shape: f32[1,32], index: 0, kind: input, shape index: {}]   ;;  %s255_s1 = inlined_call_operand.hbm [shape: f32[2,32], index: 1, kind: input, shape index: {}]   ;;  %s256_s2 = inlined_call_operand.hbm [shape: f32[2,32], index: 2, kind: output, shape index: {0}]   ;;  %s257_s3 = inlined_call_operand.hbm [shape: f32[2,32], index: 3, kind: output, shape index: {1}]  }
   0x1   :  { %10 = vsyncpa [#allocation6], 0 }
   0x2   :  { %11 = vsyncpa [#allocation4], 0 }
   0x3   :  { %12 = vsyncpa [#allocation9], 0  ;;  %s18_s14 = sshll.u32 %s254_s0, 4  ;;  %s218_s15 = smov [#allocation2]   ;;  %s19_s14 = int_to_ptr.hbm [resolvable:$true] %s18_s14 }
   0x4   :  { %s20_s16 = sshll.u32 %s218_s15, 4  ;;  %s29_s19 = sshll.u32 %s255_s1, 4  ;;  %s21_s16 = int_to_ptr.vmem [resolvable:$true] %s20_s16  ;;  %s30_s19 = int_to_ptr.hbm [resolvable:$true] %s29_s19 }
   0x5   :  { %23 = dma.hbm_to_vmem [thread:$0]  %s19_s14, 16, %s21_s16, [#allocation3]  }
   0x6   :  { %s219_s20 = smov [#allocation5]  }
   0x7   :  { %s31_s21 = sshll.u32 %s219_s20, 4  ;;  %s32_s21 = int_to_ptr.vmem [resolvable:$true] %s31_s21 }
   0x8   :  { %34 = dma.hbm_to_vmem [thread:$0]  %s30_s19, 32, %s32_s21, [#allocation6]  }
   0x9   :  { %210 = dma.done.wait [#allocation3], 16  }
   0xa   :  { %211 = vsyncadd [#allocation3], 4294967280 }
   0xb   :  { %212 = dma.done.wait [#allocation6], 32  }
   0xc   :  { %213 = vsyncadd [#allocation6], 4294967264  ;;  %v43_v0 = vld [vmem:[#allocation2] sm:$0x1]  ;;  %s220_s0 = smov [#allocation8]   ;;  %s89_s24 = sshll.u32 %s257_s3, 4  ;;  %s90_s24 = int_to_ptr.hbm [resolvable:$true] %s89_s24 }
   0xd   :  { %v105_v1 = vmul.f32 -1.442695, %v43_v0  ;;  %s87_s1 = sshll.u32 %s220_s0, 4  ;;  %vm66_vm4 = vcmask 254976   ;;  %v68_v14 = vld [vmem:[#allocation5] sm:$0x3]  ;;  %s88_s1 = int_to_ptr.vmem [resolvable:$true] %s87_s1 }
   0xe   :  { %s221_s25 = smov [#allocation7]   ;;  %s78_s29 = sshll.u32 %s256_s2, 4  ;;  %s79_s29 = int_to_ptr.hbm [resolvable:$true] %s78_s29 }
   0xf   :  { %110 = vpow2.f32 %v105_v1  ;;  %s76_s26 = sshll.u32 %s221_s25, 4  ;;  %s77_s26 = int_to_ptr.vmem [resolvable:$true] %s76_s26 }
  0x15   :  { %v111_v2 = vpop.eup %110 }
  0x16   :  { %v47_v3 = vadd.f32 1.0, %v111_v2 }
  0x18   :  { %112 = vrcp.f32 %v47_v3  ;;  %v59_v6 = vand.u32 2147483648, %v47_v3  ;;  %vm53_vm0 = vweird.f32 %v47_v3  ;;  %v57_v8 = vand.u32 2147483647, %v47_v3 }
  0x1a   :  { %v60_v10 = vor.u32 1.1754944e-38, %v59_v6  ;;  %vm58_vm3 = vcmp.eq.f32.partialorder %v57_v8, 8.507059e+37 }
  0x1e   :  { %v113_v4 = vpop.eup %112 }
  0x1f   :  { %v49_v5 = vmul.f32 %v113_v4, %v47_v3  ;;  %vm54_vm1 = vweird.f32 %v113_v4 }
  0x20   :  { %vm55_vm2 = vmor %vm53_vm0, %vm54_vm1 }
  0x21   :  { %v50_v7 = vsub.f32 1.0, %v49_v5 }
  0x23   :  { %v51_v9 = vmul.f32 %v113_v4, %v50_v7 }
  0x25   :  { %v52_v11 = vadd.f32 %v113_v4, %v51_v9 }
  0x27   :  { %v56_v12 = vsel %vm55_vm2, %v113_v4, %v52_v11 }
  0x28   :  { %v61_v13 = vsel %vm58_vm3, %v60_v10, %v56_v12 }
  0x29   :  { %v64_v15 = vperm.slane %v61_v13, 0 }
  0x2b   :  { %67 = vst.msk [vmem:[#allocation8] sm:$0x3] %vm66_vm4, %v64_v15  ;;  %v69_v16 = vmul.f32 %v68_v14, %v64_v15 }
  0x2c   :  { %92 = dma.vmem_to_hbm [thread:$0]  %s88_s1, 32, %s90_s24, [#allocation9]  }
  0x2d   :  { %70 = vst.msk [vmem:[#allocation7] sm:$0x3] %vm66_vm4, %v69_v16 }
  0x2e   :  { %81 = dma.vmem_to_hbm [thread:$0]  %s77_s26, 32, %s79_s29, [#allocation4]  }
  0x2f   :  { %214 = dma.done.wait [#allocation4], 32  }
  0x30   :  { %215 = vsyncadd [#allocation4], 4294967264 }
  0x31   :  { %216 = dma.done.wait [#allocation9], 32  }
  0x32   :  { %217 = vsyncadd [#allocation9], 4294967264 }
  0x33   :  { %101 = vsyncpa [#allocation3], 1 }
  0x34   :  { %102 = vsyncpa [#allocation6], 1 }
  0x35   :  { %103 = vsyncpa [#allocation4], 1 }
  0x36   :  { %104 = vsyncpa [#allocation9], 1 }

</bundles_post_ra>
